<compile_context>
chip_gen: v6e
topology: v6e:2x2x1
jax: 0.10.0
libtpu: 0.0.40
codegen_flags: <defaults>
</compile_context>

<pallas_src>
import functools

import jax
import jax.numpy as jnp
from jax.experimental import pallas as pl
from jax.experimental.pallas import tpu as pltpu


def _round_up(n: int, m: int) -> int:
    return ((n + m - 1) // m) * m


def _mlp_kernel(x_ref, w1_ref, b1_ref, w2_ref, b2_ref, o_ref):
    # Hidden layer: (tb, 784) @ (784, 128) with f32 accumulation on the MXU.
    h = jnp.dot(x_ref[...], w1_ref[...], preferred_element_type=jnp.float32)
    h = jnp.maximum(h + b1_ref[...], 0.0)
    # Output layer: (tb, 128) @ (128, 128-padded); lane-dense (128) store.
    out = jnp.dot(h.astype(w2_ref.dtype), w2_ref[...],
                  preferred_element_type=jnp.float32)
    o_ref[...] = (out + b2_ref[...]).astype(o_ref.dtype)


def prepare_params(w1, b1, w2, b2, compute_dtype=jnp.bfloat16):
    """Pad / cast weights once at model load (off the per-call hot path).

    w1: (784, 128), b1: (128,), w2: (128, 10), b2: (10,) stored as (in, out),
    i.e. the transposes of the torch nn.Linear weights.
    Returns (w1_c, b1_2d, w2_p, b2_p, n_out).
    """
    h_dim = w1.shape[1]
    n_out = w2.shape[1]
    n_pad = _round_up(n_out, 128)  # 10 -> 128 lanes for unmasked output stores
    w1_c = w1.astype(compute_dtype)
    w2_p = jnp.zeros((h_dim, n_pad), compute_dtype).at[:, :n_out].set(
        w2.astype(compute_dtype))
    b1_2d = b1.reshape(1, h_dim).astype(jnp.float32)
    b2_p = jnp.zeros((1, n_pad), jnp.float32).at[0, :n_out].set(
        b2.astype(jnp.float32))
    return w1_c, b1_2d, w2_p, b2_p, n_out


@functools.partial(jax.jit, static_argnames=("n_out", "tile_b"))
def deep_brain_net(x, w1, b1_2d, w2_p, b2_p, *, n_out=10, tile_b=2048):
    """Forward pass of DeepBrainNet.

    x: (B, 784); weights as produced by prepare_params().
    Returns (B, n_out) float32 logits.
    """
    B, d_in = x.shape
    h_dim = w1.shape[1]
    n_pad = w2_p.shape[1]
    compute_dtype = w1.dtype
    itemsize = jnp.dtype(compute_dtype).itemsize

    # x streamed directly from HBM (no padded copy).  Cast to the matmul input
    # dtype; ideally x already arrives in bf16 so this is a no-op.
    x_c = x.astype(compute_dtype)

    # Batch tile: multiple of 8 sublanes, capped at tile_b; also cap so the
    # grid has >= 2 iterations when possible (dual-TC sharding on v7x).
    tb = min(tile_b, _round_up(B, 8))
    if B > 8:
        tb = min(tb, _round_up(pl.cdiv(B, 2), 8))
    grid = (pl.cdiv(B, tb),)

    # Double-buffered x + out, resident weights, f32 hidden activations,
    # plus headroom for compiler temporaries.
    vmem_need = (2 * tb * d_in * itemsize        # x (double-buffered)
                 + 2 * tb * n_pad * 4            # out (double-buffered, f32)
                 + d_in * h_dim * itemsize + h_dim * 4
                 + h_dim * n_pad * itemsize + n_pad * 4
                 + tb * h_dim * 4                # hidden activations
                 + 4 * (1 << 20))
    # Floor at 32 MiB (harmless everywhere), cap at 48 MiB (< v7x's 64 MiB).
    vmem_limit = int(min(max(vmem_need, 32 << 20), 48 << 20))

    cost = pl.CostEstimate(
        flops=2 * B * d_in * h_dim + 2 * B * h_dim * n_pad,
        transcendentals=0,
        bytes_accessed=(x_c.size * itemsize
                        + (w1.size + w2_p.size) * itemsize
                        + (b1_2d.size + b2_p.size) * 4
                        + B * n_pad * 4),
    )

    out = pl.pallas_call(
        _mlp_kernel,
        out_shape=jax.ShapeDtypeStruct((B, n_pad), jnp.float32),
        grid_spec=pltpu.PrefetchScalarGridSpec(
            num_scalar_prefetch=0,
            grid=grid,
            in_specs=[
                pl.BlockSpec((tb, d_in), lambda i: (i, 0)),      # x: tiled over B
                pl.BlockSpec((d_in, h_dim), lambda i: (0, 0)),   # w1: resident
                pl.BlockSpec((1, h_dim), lambda i: (0, 0)),      # b1: resident
                pl.BlockSpec((h_dim, n_pad), lambda i: (0, 0)),  # w2: resident
                pl.BlockSpec((1, n_pad), lambda i: (0, 0)),      # b2: resident
            ],
            out_specs=pl.BlockSpec((tb, n_pad), lambda i: (i, 0)),
        ),
        compiler_params=pltpu.CompilerParams(
            dimension_semantics=("parallel",),   # dual-TC sharding on v7x
            vmem_limit_bytes=vmem_limit,
        ),
        cost_estimate=cost,
    )(x_c, w1, b1_2d, w2_p, b2_p)

    return out[:, :n_out]


def _init_params(key):
    """Deterministic init mimicking torch.nn.Linear default
    (uniform in [-1/sqrt(fan_in), 1/sqrt(fan_in)])."""
    k1, k2, k3, k4 = jax.random.split(key, 4)
    bound1 = 1.0 / jnp.sqrt(784.0)
    bound2 = 1.0 / jnp.sqrt(128.0)
    w1 = jax.random.uniform(k1, (784, 128), jnp.float32, -bound1, bound1)
    b1 = jax.random.uniform(k2, (128,), jnp.float32, -bound1, bound1)
    w2 = jax.random.uniform(k3, (128, 10), jnp.float32, -bound2, bound2)
    b2 = jax.random.uniform(k4, (10,), jnp.float32, -bound2, bound2)
    return w1, b1, w2, b2


if __name__ == "__main__":
    key = jax.random.PRNGKey(0)
    k_x, k_p = jax.random.split(key)

    B = 10  # small, non-multiple-of-8 batch exercises the ragged last block
    x = jax.random.normal(k_x, (B, 784), jnp.float32)
    w1, b1, w2, b2 = _init_params(k_p)

    # Pure-JAX reference.
    ref = jnp.maximum(x @ w1 + b1, 0.0) @ w2 + b2

    # Default fast path: bf16 matmul inputs, f32 accumulation.
    w1c, b1_2d, w2_p, b2_p, n_out = prepare_params(w1, b1, w2, b2,
                                                   compute_dtype=jnp.bfloat16)
    out_bf16 = deep_brain_net(x, w1c, b1_2d, w2_p, b2_p, n_out=n_out)
    out_bf16 = jax.block_until_ready(out_bf16)
    assert out_bf16.shape == (B, 10)
    assert jnp.allclose(out_bf16, ref, atol=1e-1, rtol=1e-1), "bf16 mismatch vs reference"

    # f32-input path (tolerance-level match to the PyTorch module).
    w1f, b1f, w2f, b2f, n_out = prepare_params(w1, b1, w2, b2,
                                               compute_dtype=jnp.float32)
    out_f32 = deep_brain_net(x, w1f, b1f, w2f, b2f, n_out=n_out)
    out_f32 = jax.block_until_ready(out_f32)
    assert out_f32.shape == (B, 10)
    assert jnp.allclose(out_f32, ref, atol=1e-3, rtol=1e-3), "f32 mismatch vs reference"

    print("KERNEL_OK")
</pallas_src>

<mosaic_0001>
module attributes {stable_mosaic.version = 11 : i64} {
  func.func @_mlp_kernel(%arg0: i32, %arg1: memref<8x784xbf16, #tpu.memory_space<vmem>>, %arg2: memref<784x128xbf16, #tpu.memory_space<vmem>>, %arg3: memref<1x128xf32, #tpu.memory_space<vmem>>, %arg4: memref<128x128xbf16, #tpu.memory_space<vmem>>, %arg5: memref<1x128xf32, #tpu.memory_space<vmem>>, %arg6: memref<8x128xf32, #tpu.memory_space<vmem>>) attributes {dimension_semantics = [#tpu.dimension_semantics<parallel>], iteration_bounds = array<i64: 2>, scalar_prefetch = 0 : i64, scratch_operands = 0 : i64, tpu.core_type = #tpu.core_type<tc>, window_params = [{transform_indices = @transform_0, window_bounds = array<i64: 8, 784>}, {pipeline_mode = #tpu.pipeline_mode<synchronous>, transform_indices = @transform_1, window_bounds = array<i64: 784, 128>}, {pipeline_mode = #tpu.pipeline_mode<synchronous>, transform_indices = @transform_2, window_bounds = array<i64: 1, 128>}, {pipeline_mode = #tpu.pipeline_mode<synchronous>, transform_indices = @transform_3, window_bounds = array<i64: 128, 128>}, {pipeline_mode = #tpu.pipeline_mode<synchronous>, transform_indices = @transform_4, window_bounds = array<i64: 1, 128>}, {transform_indices = @transform_5, window_bounds = array<i64: 8, 128>}]} {
    %c0 = arith.constant 0 : index
    %c0_0 = arith.constant 0 : index
    %0 = vector.load %arg1[%c0, %c0_0] : memref<8x784xbf16, #tpu.memory_space<vmem>>, vector<8x784xbf16>
    %c0_1 = arith.constant 0 : index
    %c0_2 = arith.constant 0 : index
    %1 = vector.load %arg2[%c0_1, %c0_2] : memref<784x128xbf16, #tpu.memory_space<vmem>>, vector<784x128xbf16>
    %cst = arith.constant dense<0.000000e+00> : vector<8x128xf32>
    %2 = tpu.matmul %0, %1, %cst {dimension_numbers = #tpu.dot_dimension_numbers<[1], [0], [0], [1], [0, 0, 1, 1], [], []>} : vector<8x784xbf16>, vector<784x128xbf16>, vector<8x128xf32> -> vector<8x128xf32>
    %c0_3 = arith.constant 0 : index
    %c0_4 = arith.constant 0 : index
    %3 = vector.load %arg3[%c0_3, %c0_4] : memref<1x128xf32, #tpu.memory_space<vmem>>, vector<1x128xf32>
    %4 = vector.broadcast %3 : vector<1x128xf32> to vector<8x128xf32>
    %5 = arith.addf %2, %4 : vector<8x128xf32>
    %cst_5 = arith.constant 0.000000e+00 : f32
    %6 = vector.broadcast %cst_5 : f32 to vector<8x128xf32>
    %7 = arith.maximumf %5, %6 : vector<8x128xf32>
    %8 = arith.truncf %7 : vector<8x128xf32> to vector<8x128xbf16>
    %c0_6 = arith.constant 0 : index
    %c0_7 = arith.constant 0 : index
    %9 = vector.load %arg4[%c0_6, %c0_7] : memref<128x128xbf16, #tpu.memory_space<vmem>>, vector<128x128xbf16>
    %cst_8 = arith.constant dense<0.000000e+00> : vector<8x128xf32>
    %10 = tpu.matmul %8, %9, %cst_8 {dimension_numbers = #tpu.dot_dimension_numbers<[1], [0], [0], [1], [0, 0, 1, 1], [], []>} : vector<8x128xbf16>, vector<128x128xbf16>, vector<8x128xf32> -> vector<8x128xf32>
    %c0_9 = arith.constant 0 : index
    %c0_10 = arith.constant 0 : index
    %11 = vector.load %arg5[%c0_9, %c0_10] : memref<1x128xf32, #tpu.memory_space<vmem>>, vector<1x128xf32>
    %12 = vector.broadcast %11 : vector<1x128xf32> to vector<8x128xf32>
    %13 = arith.addf %10, %12 : vector<8x128xf32>
    %c0_11 = arith.constant 0 : index
    %c0_12 = arith.constant 0 : index
    %14 = vector.load %arg6[%c0_11, %c0_12] : memref<8x128xf32, #tpu.memory_space<vmem>>, vector<8x128xf32>
    tpu.vector_store %arg6[%c0_11, %c0_12], %13 {strides = array<i32>} : memref<8x128xf32, #tpu.memory_space<vmem>>, vector<8x128xf32>,
    return
  }
  func.func @transform_0(%arg0: i32) -> (i32, i32) {
    %c0_i32 = arith.constant 0 : i32
    %c0_i32_0 = arith.constant 0 : i32
    return %arg0, %c0_i32 : i32, i32
  }
  func.func @transform_1(%arg0: i32) -> (i32, i32) {
    %c0_i32 = arith.constant 0 : i32
    %c0_i32_0 = arith.constant 0 : i32
    %c0_i32_1 = arith.constant 0 : i32
    return %c0_i32, %c0_i32_0 : i32, i32
  }
  func.func @transform_2(%arg0: i32) -> (i32, i32) {
    %c0_i32 = arith.constant 0 : i32
    %c0_i32_0 = arith.constant 0 : i32
    %c0_i32_1 = arith.constant 0 : i32
    return %c0_i32, %c0_i32_0 : i32, i32
  }
  func.func @transform_3(%arg0: i32) -> (i32, i32) {
    %c0_i32 = arith.constant 0 : i32
    %c0_i32_0 = arith.constant 0 : i32
    %c0_i32_1 = arith.constant 0 : i32
    return %c0_i32, %c0_i32_0 : i32, i32
  }
  func.func @transform_4(%arg0: i32) -> (i32, i32) {
    %c0_i32 = arith.constant 0 : i32
    %c0_i32_0 = arith.constant 0 : i32
    %c0_i32_1 = arith.constant 0 : i32
    return %c0_i32, %c0_i32_0 : i32, i32
  }
  func.func @transform_5(%arg0: i32) -> (i32, i32) {
    %c0_i32 = arith.constant 0 : i32
    %c0_i32_0 = arith.constant 0 : i32
    return %arg0, %c0_i32 : i32, i32
  }
}

</mosaic_0001>

<bundles_post_ra>
// kernel: deep_brain_net.1
= control target key start
LH: loop header
LB: loop body
LE: loop exit
PB: predicated region body
PF: predicated region fallthrough
CT: control target
= control target key end

     0   :  { %10 = vsyncpa [#allocation3], 0  ;;  %s1624_s0 = inlined_call_operand.vmem [shape: bf16[10,784], index: 0, kind: input, shape index: {}]   ;;  %s1625_s1 = inlined_call_operand.hbm [shape: bf16[784,128], index: 1, kind: input, shape index: {}]   ;;  %s1626_s2 = inlined_call_operand.vmem [shape: f32[1,128], index: 2, kind: input, shape index: {}]   ;;  %s1627_s3 = inlined_call_operand.vmem [shape: bf16[128,128], index: 3, kind: input, shape index: {}]   ;;  %s1628_s4 = inlined_call_operand.vmem [shape: f32[1,128], index: 4, kind: input, shape index: {}]   ;;  %s1629_s5 = inlined_call_operand.hbm [shape: f32[10,128], index: 5, kind: output, shape index: {}]  }
   0x1   :  { %11 = vsyncpa [#allocation4], 0 }
   0x2   :  { %13 = vsyncpa [#allocation4 + $0x1], 0  ;;  %s1458_s18 = smov 0   ;;  %s1460_s19 = smov 0  }
   0x3   :  { %s1462_s20 = smov 0   ;;  %s1464_s21 = smov 0  }
   0x4 LB: > { %s1479_s22 = sadd.s32 4294967295, %s1420_s21   ;;  %s1029_s23 = sadd.s32 4294967294, %s1420_s21   ;;  %s1420_s21 = sphi %s1464_s21, %s1637_s21   ;;  %s1416_s20 = sphi %s1462_s20, %s1636_s20   ;;  %s1412_s19 = sphi %s1460_s19, %s1635_s19   ;;  %s1408_s18 = sphi %s1458_s18, %s1634_s18  }
   0x5   : > { %s1483_s24 = sadd.s32 1, %s1420_s21   ;;  %s136_s25 = sadd.s32 1, %s1416_s20 }
   0x6   : > { %s133_s26 = ssub.s32 %s1420_s21, %s1483_s24  ;;  %p146_p0 = scmp.ne.s32.totalorder %s1416_s20, %s1412_s19 }
   0x7   : > { %p134_p1 = scmp.eq.s32.totalorder %s133_s26, 0  ;;  %p147_p2 = scmp.eq.s32.totalorder %s1479_s22, 1 }
   0x8   : > { %p152_p3 = scmp.ne.s32.totalorder %s1412_s19, %s1408_s18  ;;  %p153_p4 = scmp.eq.s32.totalorder %s1029_s23, 1 }
   0x9   : > { %s1494_s27 = scalar_select %p134_p1, %s1416_s20, %s136_s25  }
   0xa   : > { %p1496_p5 = por %p147_p2, %p146_p0  ;;  %p1500_p6 = por %p153_p4, %p152_p3 }
   0xb   : > { %p1030_p7 = scmp.ge.s32.totalorder %s1420_s21, 1  ;;  %p160_p8 = scmp.lt.s32.totalorder %s1420_s21, 3 }
   0xc   : > { %s1631_s29 = scalar_select %p1500_p6, 1, 0 }
   0xd   : > { %p1226_p9 = scmp.eq.s32.totalorder %s1479_s22, 0  ;;  %p1507_p10 = pnand %p1030_p7, %p160_p8 }
   0xe   : > { %s1422_s6 = smov [#allocation2]  }
   0xf   : > { %s172_s7 = sshll.u32 %s1422_s6, 4  ;;  %p1218_p11 = pneg %p1507_p10  ;;  %s173_s7 = int_to_ptr.vmem [resolvable:$true] %s172_s7 }
  0x10   : > { %s1341_s8 = scalar_lea.vmem %s173_s7, 6272  ;;  %p1349_p3 = scmp.lt.s32.totalorder %s173_s7, %s173_s7 }
  0x11   : > { %p1219_p12 = pnand %p1226_p9, %p1218_p11  ;;  %p1342_p0 = scmp.ne.s32.totalorder %s173_s7, %s1341_s8 }
  0x12   : > { %p1350_p4 = scmp.lt.s32.totalorder %s1341_s8, %s1341_s8 }
  0x13   : > { %p1332_p13 = pneg %p1219_p12 }
  0x14   : > { %p1351_p6 = por %p1350_p4, %p1349_p3 }
  0x15   : > { %p1344_p1 = pnand %p1342_p0, %p1332_p13 }
  0x17   : > { %p1345_p2 = pneg %p1344_p1 }
  0x19   : > { %p1352_p7 = pnand %p1351_p6, %p1345_p2 }
  0x1b   : > { %1355 = shalt.err (!%p1352_p7)
}
  0x1c   : > { %s1423_s9 = smov 64   ;;  %s1424_s10 = smov 4  }
  0x1d   : > { %1221 = dma.hbm_to_vmem [thread:$0]  (!%p1219_p12), %s1625_s1, 6272, %s173_s7, [#allocation3], %s1423_s9, %s1423_s9, %s1424_s10  }
  0x1e   : > { %205 = sbr.rel (%p1507_p10) target bundleno = 515 (0x203), region = 40 }
  0x23   : > { %1399 = dma.done.wait (%p1226_p9), [#allocation3], 6272  }
  0x24   : > { %1401 = vsyncadd (%p1226_p9), [#allocation3], 4294961024  ;;  %v1266_v0 = vld [vmem:[#allocation2 + $0x78] sm:$0xff]   ;;  %v1270_v4 = vld [vmem:[#allocation2 + $0x70] sm:$0xff]   ;;  %p233_p6 = scmp.lt.s32.totalorder %s1479_s22, 1  ;;  %v1425_v41 = vmov 0.0  }
  0x25   : > { %v1267_v1 = vld [vmem:[#allocation2 + $0x38] sm:$0xff]   ;;  %1108 = vmatprep.subr.bf16.mxu0 %v1266_v0  ;;  %v1271_v5 = vld [vmem:[#allocation2 + $0x30] sm:$0xff]   ;;  %v1274_v8 = vld [vmem:[#allocation2 + $0x68] sm:$0xff]   ;;  %vm1426_vm0 = vmmov 0   ;;  %vm666_vm1 = vcmask 130048   ;;  %s230_s26 = sand.u32 1, %s1412_s19  }
  0x26   : > { %v1268_v2 = vld [vmem:[#allocation2 + $0xf8] sm:$0xff]   ;;  %1109 = vmatpush3.bf16.msra.mxu0 %v1267_v1  ;;  %v1272_v6 = vld [vmem:[#allocation2 + $0xf0] sm:$0xff]   ;;  %v1275_v9 = vld [vmem:[#allocation2 + $0x28] sm:$0xff]   ;;  %s234_s13 = scalar_select %p233_p6, %s1479_s22, 1 }
  0x27   : > { %v1269_v3 = vld [vmem:[#allocation2 + $0xb8] sm:$0xff]   ;;  %1130 = vmatprep.subr.bf16.mxu1 %v1268_v2  ;;  %1110 = vmatprep.subr.bf16.mxu0 %v1270_v4  ;;  %v1273_v7 = vld [vmem:[#allocation2 + $0xb0] sm:$0xff]   ;;  %v1276_v10 = vld [vmem:[#allocation2 + $0xe8] sm:$0xff]   ;;  %s1035_s30 = sshll.u32 %s230_s26, 3  ;;  %s1105_s8 = sshll.u32 %s1479_s22, 7 }
  0x28   : > { %1131 = vmatpush3.bf16.msra.mxu1 %v1269_v3  ;;  %v1277_v11 = vld [vmem:[#allocation2 + $0xa8] sm:$0xff]   ;;  %v1278_v12 = vld [vmem:[#allocation2 + $0x60] sm:$0xff]   ;;  %v1282_v16 = vld [vmem:[#allocation2 + $0x58] sm:$0xff]   ;;  %s1211_s14 = smul.u32 28, %s234_s13  ;;  %s232_s9 = scalar_lea.vmem [#allocation5], %s1035_s30 }
  0x29   : > { %1132 = vmatprep.subr.bf16.mxu1 %v1272_v6  ;;  %v1279_v13 = vld [vmem:[#allocation2 + $0x20] sm:$0xff]   ;;  %v1283_v17 = vld [vmem:[#allocation2 + $0x18] sm:$0xff]   ;;  %v1286_v20 = vld [vmem:[#allocation2 + $0x50] sm:$0xff]   ;;  %s958_s10 = sshll.u32 %s232_s9, 4  ;;  %s1583_s13 = scalar_lea.hbm %s1629_s5, %s1105_s8  ;;  %s1585_s10 = int_to_ptr.vmem [resolvable:$true] %s958_s10 }
  0x2a   : > { %1111 = vmatpush3.bf16.msra.mxu0 %v1271_v5  ;;  %v1280_v14 = vld [vmem:[#allocation2 + $0xe0] sm:$0xff]   ;;  %v1284_v18 = vld [vmem:[#allocation2 + $0xd8] sm:$0xff]   ;;  %v1287_v21 = vld [vmem:[#allocation2 + $0x10] sm:$0xff]   ;;  %s1529_s17 = scalar_lea.vmem %s1624_s0, %s1211_s14  ;;  %s945_s14 = scalar_lea.sflag [#allocation4], %s230_s26 }
  0x2b   : > { %1112 = vmatprep.subr.bf16.mxu0 %v1274_v8  ;;  %v1281_v15 = vld [vmem:[#allocation2 + $0xa0] sm:$0xff]   ;;  %v1285_v19 = vld [vmem:[#allocation2 + $0x98] sm:$0xff]   ;;  %v1288_v22 = vld [vmem:[#allocation2 + $0xd0] sm:$0xff]   ;;  %s1356_s15 = scalar_lea.vmem %s1585_s10, 128  ;;  %s1427_s22 = smov [#allocation5]  }
  0x2c   : > { %1133 = vmatpush3.bf16.msra.mxu1 %v1273_v7  ;;  %v1289_v23 = vld [vmem:[#allocation2 + $0x90] sm:$0xff]   ;;  %v1290_v24 = vld [vmem:[#allocation2 + $0x48] sm:$0xff]   ;;  %v1294_v28 = vld [vmem:[#allocation2 + $0x40] sm:$0xff]   ;;  %p1357_p8 = scmp.ne.s32.totalorder %s1585_s10, %s1356_s15  ;;  %s1360_s16 = sshll.u32 %s1427_s22, 4  ;;  %s1361_s16 = int_to_ptr.vmem [resolvable:$false] %s1360_s16 }
  0x2d   : > { %1134 = vmatprep.subr.bf16.mxu1 %v1276_v10  ;;  %v1291_v25 = vld [vmem:[#allocation2 + $0x8] sm:$0xff]   ;;  %v1295_v29 = vld [vmem:[#allocation2] sm:$0xff]   ;;  %v1301_v35 = vld [vmem:[#allocation2 + $0x178] sm:$0xff]   ;;  %p1363_p11 = scmp.lt.s32.totalorder %s1585_s10, %s1361_s16 }
  0x2e   : > { %1113 = vmatpush3.bf16.msra.mxu0 %v1275_v9  ;;  %v1292_v26 = vld [vmem:[#allocation2 + $0xc8] sm:$0xff]   ;;  %v1296_v30 = vld [vmem:[#allocation2 + $0xc0] sm:$0xff]   ;;  %v1304_v39 = vld [vmem:[#allocation2 + $0x138] sm:$0xff]   ;;  %p1358_p9 = pnand %p1357_p8, %p1496_p5 }
  0x2f   : > { %1114 = vmatprep.subr.bf16.mxu0 %v1278_v12  ;;  %v1293_v27 = vld [vmem:[#allocation2 + $0x88] sm:$0xff]   ;;  %v239_v31 = vld [vmem:[%s1529_s17] sm:$0xff]  ;;  %v1305_v40 = vld [vmem:[#allocation2 + $0x170] sm:$0xff]  }
  0x30   : > { %1135 = vmatpush3.bf16.msra.mxu1 %v1277_v11  ;;  %v1038_v32 = vcombine.low %v239_v31, %v239_v31  ;;  %v1039_v33 = vcombine.high %v239_v31, %v239_v31  ;;  %v1300_v34 = vld [vmem:[#allocation2 + $0x80] sm:$0xff]   ;;  %v240_v36 = vld [vmem:[%s1529_s17 + $0x8] sm:$0xff]  ;;  %v1306_v42 = vld [vmem:[#allocation2 + $0x130] sm:$0xff]   ;;  %p1359_p10 = pneg %p1358_p9 }
  0x31   : > { %1136 = vmatprep.subr.bf16.mxu1 %v1280_v14  ;;  %v1040_v37 = vcombine.low %v240_v36, %v240_v36  ;;  %v1041_v38 = vcombine.high %v240_v36, %v240_v36  ;;  %v1307_v43 = vld [vmem:[#allocation2 + $0x168] sm:$0xff]   ;;  %v1309_v45 = vld [vmem:[#allocation2 + $0x160] sm:$0xff]   ;;  %v1311_v47 = vld [vmem:[#allocation2 + $0x158] sm:$0xff]  }
  0x32   : > { %1115 = vmatpush3.bf16.msra.mxu0 %v1279_v13  ;;  %702 = vmatprep.mubr.bf16.mxu0 %v1039_v33  ;;  %v1308_v44 = vld [vmem:[#allocation2 + $0x128] sm:$0xff]   ;;  %v1310_v46 = vld [vmem:[#allocation2 + $0x120] sm:$0xff]   ;;  %v1312_v48 = vld [vmem:[#allocation2 + $0x118] sm:$0xff]  }
  0x33   : > { %1116 = vmatprep.subr.bf16.mxu0 %v1282_v16  ;;  %742 = vmatprep.mubr.bf16.mxu1 %v1041_v38  ;;  %v1299_v49 = vld [vmem:[%s1529_s17 + $0x18] ss:$0 sps:$4 sm:$0xff]   ;;  %v1313_v50 = vld [vmem:[#allocation2 + $0x150] sm:$0xff]   ;;  %v1319_v51 = vld [vmem:[#allocation2 + $0x180] sm:$0xff]  }
  0x34   : > { %1137 = vmatpush3.bf16.msra.mxu1 %v1281_v15  ;;  %v241_v52 = vld [vmem:[%s1529_s17 + $0x10] sm:$0xff]  ;;  %v1315_v55 = vld [vmem:[#allocation2 + $0x148] sm:$0xff]   ;;  %v1317_v57 = vld [vmem:[#allocation2 + $0x140] sm:$0xff]   ;;  %s1362_s17 = scalar_lea.vmem %s1361_s16, 256 }
  0x35   : > { %1138 = vmatprep.subr.bf16.mxu1 %v1284_v18  ;;  %v1314_v53 = vld [vmem:[#allocation2 + $0x110] sm:$0xff]   ;;  %v1043_v54 = vcombine.high %v241_v52, %v241_v52  ;;  %v1316_v56 = vld [vmem:[#allocation2 + $0x108] sm:$0xff]   ;;  %v1318_v58 = vld [vmem:[#allocation2 + $0x100] sm:$0xff]   ;;  %v1042_v59 = vcombine.low %v241_v52, %v241_v52  ;;  %p1364_p12 = scmp.lt.s32.totalorder %s1362_s17, %s1356_s15 }
  0x36   : > { %1117 = vmatpush3.bf16.msra.mxu0 %v1283_v17  ;;  %v1322_v60 = vld [vmem:[%s1627_s3 + $0x38] sm:$0xff]   ;;  %v1323_v61 = vld [vmem:[%s1627_s3 + $0x30] sm:$0xff]   ;;  %v1324_v62 = vld [vmem:[%s1627_s3 + $0x28] sm:$0xff]  }
  0x37   : > { %1118 = vmatprep.subr.bf16.mxu0 %v1286_v20  ;;  %v1325_v63 = vld [vmem:[%s1627_s3 + $0x20] sm:$0xff]   ;;  %v1326_v0 = vld [vmem:[%s1627_s3 + $0x18] sm:$0xff]   ;;  %v1327_v1 = vld [vmem:[%s1627_s3 + $0x10] sm:$0xff]   ;;  %p1365_p13 = por %p1364_p12, %p1363_p11 }
  0x38   : > { %1139 = vmatpush3.bf16.msra.mxu1 %v1285_v19  ;;  %v1328_v2 = vld [vmem:[%s1627_s3 + $0x8] sm:$0xff]   ;;  %v1329_v3 = vld [vmem:[%s1627_s3] sm:$0xff]  }
  0x39   : > { %1140 = vmatprep.subr.bf16.mxu1 %v1288_v22  ;;  %v1037_v17 = vld [vmem:[%s1626_s2] ss:$0 sm:$0xff]  ;;  %p1366_p0 = pnand %p1365_p13, %p1359_p10 }
  0x3a   : > { %1119 = vmatpush3.bf16.msra.mxu0 %v1287_v21 }
  0x3b   : > { %1120 = vmatprep.subr.bf16.mxu0 %v1290_v24 }
  0x3c   : > { %1141 = vmatpush3.bf16.msra.mxu1 %v1289_v23 }
  0x3d   : > { %1142 = vmatprep.subr.bf16.mxu1 %v1292_v26 }
  0x3e   : > { %1121 = vmatpush3.bf16.msra.mxu0 %v1291_v25 }
  0x3f   : > { %1122 = vmatprep.subr.bf16.mxu0 %v1294_v28 }
  0x40   : > { %1143 = vmatpush3.bf16.msra.mxu1 %v1293_v27 }
  0x41   : > { %1144 = vmatprep.subr.bf16.mxu1 %v1296_v30  ;;  %v1095_v30 = vld [vmem:[%s1628_s4] ss:$0 sm:$0xff] }
  0x42   : > { %1123 = vmatpush3.bf16.msra.mxu0 %v1295_v29 }
  0x43   : > { %1152 = vmatprep.subr.bf16.mxu0 %v1301_v35 }
  0x44   : > { %1145 = vmatpush3.bf16.msra.mxu1 %v1300_v34 }
  0x45   : > { %703 = vmatmul.mubr.bf16.vlgmr.msra.gmra.mxu0 %v1038_v32  ;;  %1185 = vmatprep.subr.bf16.mxu1 %v1425_v41 }
  0x46   : > { %1153 = vmatpush3.bf16.msra.mxu0 %v1304_v39  ;;  %782 = vmatprep.mubr.bf16.mxu0 %v1043_v54 }
  0x47   : > { %743 = vmatmul.mubr.bf16.vlgmr.msra.gmra.mxu1 %v1040_v37  ;;  %1154 = vmatprep.subr.bf16.mxu0 %v1305_v40 }
  0x48   : > { %1187 = vmatprep.mubr.msk.bf16.mxu1 %vm1426_vm0, %v1425_v41  ;;  %1186 = vmatpush3.bf16.msra.mxu1 %v1319_v51 }
  0x49   : > { %1191 = vmatprep.subr.bf16.mxu1 %v1425_v41 }
  0x4a   : > { %1155 = vmatpush3.bf16.msra.mxu0 %v1306_v42 }
  0x4b   : > { %1156 = vmatprep.subr.bf16.mxu0 %v1307_v43 }
  0x4e   : > { %1157 = vmatpush3.bf16.msra.mxu0 %v1308_v44 }
  0x4f   : > { %1158 = vmatprep.subr.bf16.mxu0 %v1309_v45  ;;  %1188 = vmatmul.mubr.msk.bf16.vlgmr.msra.gmra.mxu1 %vm666_vm1, %v1299_v49 }
  0x50   : > { %1207 = vmatprep.mubr.msk.bf16.mxu1 %vm1426_vm0, %v1425_v41  ;;  %1192 = vmatpush3.bf16.msra.mxu1 %v1322_v60 }
  0x51   : > { %1193 = vmatprep.subr.bf16.mxu1 %v1425_v41 }
  0x52   : > { %1159 = vmatpush3.bf16.msra.mxu0 %v1310_v46 }
  0x53   : > { %1160 = vmatprep.subr.bf16.mxu0 %v1311_v47 }
  0x54   : > { %1194 = vmatpush3.bf16.msra.mxu1 %v1323_v61 }
  0x55   : > { %1195 = vmatprep.subr.bf16.mxu1 %v1425_v41 }
  0x56   : > { %1161 = vmatpush3.bf16.msra.mxu0 %v1312_v48 }
  0x57   : > { %1162 = vmatprep.subr.bf16.mxu0 %v1313_v50 }
  0x58   : > { %1196 = vmatpush3.bf16.msra.mxu1 %v1324_v62 }
  0x59   : > { %1197 = vmatprep.subr.bf16.mxu1 %v1425_v41 }
  0x5a   : > { %1163 = vmatpush3.bf16.msra.mxu0 %v1314_v53 }
  0x5b   : > { %1164 = vmatprep.subr.bf16.mxu0 %v1315_v55 }
  0x5c   : > { %1198 = vmatpush3.bf16.msra.mxu1 %v1325_v63 }
  0x5d   : > { %1199 = vmatprep.subr.bf16.mxu1 %v1425_v41 }
  0x5e   : > { %1165 = vmatpush3.bf16.msra.mxu0 %v1316_v56 }
  0x5f   : > { %1166 = vmatprep.subr.bf16.mxu0 %v1317_v57 }
  0x60   : > { %1200 = vmatpush3.bf16.msra.mxu1 %v1326_v0 }
  0x61   : > { %1201 = vmatprep.subr.bf16.mxu1 %v1425_v41 }
  0x62   : > { %1167 = vmatpush3.bf16.msra.mxu0 %v1318_v58 }
  0x64   : > { %1202 = vmatpush3.bf16.msra.mxu1 %v1327_v1 }
  0x65   : > { %783 = vmatmul.mubr.bf16.vlgmr.msra.gmra.mxu0 %v1042_v59  ;;  %1203 = vmatprep.subr.bf16.mxu1 %v1425_v41 }
  0x68   : > { %1204 = vmatpush3.bf16.msra.mxu1 %v1328_v2 }
  0x69   : > { %1205 = vmatprep.subr.bf16.mxu1 %v1425_v41 }
  0x6c   : > { %1206 = vmatpush3.bf16.msra.mxu1 %v1329_v3 }
 0x105   : > { %v1124_v4 = vpop.f32.mrf.mxu0 }
 0x107   : > { %v1125_v5 = vpop.f32.mrf.mxu0  ;;  %v1146_v6 = vpop.f32.mrf.mxu1 }
 0x108   : > { %v1126_v16 = vadd.f32 %v1125_v5, %v1124_v4 }
 0x109   : > { %v1127_v7 = vpop.f32.mrf.mxu0  ;;  %v1147_v8 = vpop.f32.mrf.mxu1 }
 0x10a   : > { %v705_v18 = vadd.f32 %v1126_v16, %v1037_v17  ;;  %v1148_v19 = vadd.f32 %v1147_v8, %v1146_v6 }
 0x10b   : > { %v1128_v9 = vpop.f32.mrf.mxu0  ;;  %v1149_v10 = vpop.f32.mrf.mxu1 }
 0x10c   : > { %v745_v22 = vadd.f32 %v1148_v19, %v705_v18 }
 0x10d   : > { %v1150_v11 = vpop.f32.mrf.mxu1 }
 0x10f   : > { %v824_v12 = vpop.f32.mrf.mxu1 }
 0x111   : > { %v1189_v13 = vpop.f32.mrf.mxu1 }
 0x113   : > { %v827_v14 = vpop.f32.mrf.mxu1 }
 0x115   : > { %v1190_v15 = vpop.f32.mrf.mxu1 }
 0x125   : > { %v1168_v20 = vpop.f32.mrf.mxu0 }
 0x127   : > { %v1169_v21 = vpop.f32.mrf.mxu0 }
 0x128   : > { %v1170_v23 = vadd.f32 %v1169_v21, %v1168_v20 }
 0x129   : > { %v1171_v24 = vpop.f32.mrf.mxu0 }
 0x12a   : > { %v785_v25 = vadd.f32 %v1170_v23, %v745_v22 }
 0x12b   : > { %v1172_v26 = vpop.f32.mrf.mxu0 }
 0x12c   : > { %v825_v27 = vadd.f32 %v824_v12, %v785_v25 }
 0x12e   : > { %v830_v28 = vmax.f32 %v825_v27, 0.0 }
 0x130   : > { %v831_v29 = vpack.c.bf16 %v830_v28, %v830_v28 }
 0x132   : > { %1208 = vmatmul.mubr.bf16.vlgmr.msra.gmra.mxu1 %v831_v29 }
 0x1f2   : > { %v937_v31 = vpop.f32.mrf.mxu1 }
 0x1f3   : > { %v938_v32 = vadd.f32 %v1095_v30, %v937_v31 }
 0x1f4   : > { %v1209_v33 = vpop.f32.mrf.mxu1 }
 0x1f5   : > { %943 = vst [vmem:[%s232_s9] sm:$0xff] %v938_v32 }
 0x1f6   : > { %v940_v34 = vpop.f32.mrf.mxu1 }
 0x1f7   : > { %1369 = shalt.err (!%p1366_p0)
}
 0x1f8   : > { %s1370_s23 = scalar_lea.hbm %s1583_s13, 128  ;;  %s1374_s30 = scalar_lea.hbm %s1629_s5, 256 }
 0x1f9   : > { %p1371_p1 = scmp.ne.s32.totalorder %s1583_s13, %s1370_s23  ;;  %p1375_p4 = scmp.lt.s32.totalorder %s1583_s13, %s1629_s5 }
 0x1fa   : > { %p1376_p7 = scmp.lt.s32.totalorder %s1374_s30, %s1370_s23 }
 0x1fb   : > { %p1372_p2 = pnand %p1371_p1, %p1496_p5 }
 0x1fc   : > { %p1377_p6 = por %p1376_p7, %p1375_p4 }
 0x1fd   : > { %p1373_p3 = pneg %p1372_p2 }
 0x1ff   : > { %p1378_p8 = pnand %p1377_p6, %p1373_p3 }
 0x201   : > { %1381 = shalt.err (!%p1378_p8)
}
 0x202   : > { %1216 = dma.vmem_to_hbm [thread:$0]  (%p1496_p5), %s1585_s10, 128, %s1583_s13, %s945_s14   ;;  %v1210_v35 = vpop.f32.mrf.mxu1 }
 0x203 PF: > { %p1228_p9 = scmp.ge.s32.totalorder %s1420_s21, 2  ;;  %s970_s8 = sand.u32 1, %s1408_s18  }
 0x204   : > { %p1633_p10 = scmp.ne.s32.totalorder %s1631_s29, 0  ;;  %s971_s9 = scalar_lea.sflag [#allocation4], %s970_s8 }
 0x206   : > { %p1223_p11 = pnand %p1228_p9, %p1633_p10 }
 0x208   : > { %p1224_p12 = pneg %p1223_p11 }
 0x20a   : > { %1403 = dma.done.wait (%p1224_p12), %s971_s9, 128  }
 0x20b   : > { %1405 = vsyncadd (%p1224_p12), %s971_s9, 4294967168  ;;  %p16_p13 = scmp.ge.s32.totalorder %s1483_s24, 4   ;;  %s1634_s18 = smov %s1412_s19 }
 0x20c   : > { %s1635_s19 = smov %s1416_s20  ;;  %s1636_s20 = smov %s1494_s27 }
 0x20d   : > { %s1637_s21 = smov %s1483_s24  ;;  %18 = sbr.rel (!%p16_p13) target bundleno = 4 (0x4), region = 80 }
 0x212   :  { %976 = vsyncpa [#allocation3], 1 }
 0x213   :  { %978 = vsyncpa [#allocation3 + $0x1], 1 }
 0x214   :  { %979 = vsyncpa [#allocation4], 1 }
 0x215   :  { %981 = vsyncpa [#allocation4 + $0x1], 1 }

</bundles_post_ra>
